<compile_context>
chip_gen: v5e
topology: v5e:2x2
jax: 0.10.0
libtpu: 0.0.40
codegen_flags: <defaults>
</compile_context>

<pallas_src>
import functools
import math

import jax
import jax.numpy as jnp
from jax.experimental import pallas as pl
from jax.experimental.pallas import tpu as pltpu


# -----------------------------------------------------------------------------
# Kernel
# -----------------------------------------------------------------------------
def _featurizer_kernel(x_ref, w_ref, o_ref, *, normalize: bool):
    """Grid: (B_pad // tb, K_pad // tk); K is the trailing reduction axis.

    x_ref: (tb, tk) native-dtype activation tile (cast to bf16 in-kernel)
    w_ref: (tk, D)  bf16 weight tile
    o_ref: (tb, D)  f32 output block, resident across the K axis (accumulator)
    """
    k = pl.program_id(1)

    @pl.when(k == 0)
    def _():
        o_ref[...] = jnp.zeros_like(o_ref)

    # Cast activations in VMEM right before the MXU op (no separate HBM cast
    # pass in the wrapper); accumulation stays f32 in the output block.
    x = x_ref[...].astype(jnp.bfloat16)
    o_ref[...] += jnp.dot(x, w_ref[...], preferred_element_type=jnp.float32)

    if normalize:
        @pl.when(k == pl.num_programs(1) - 1)
        def _():
            feats = o_ref[...]
            sq = jnp.sum(feats * feats, axis=-1, keepdims=True)
            # F.normalize: x / max(||x||, 1e-12) == x * rsqrt(max(||x||^2, 1e-24))
            o_ref[...] = feats * jax.lax.rsqrt(jnp.maximum(sq, 1e-24))


# -----------------------------------------------------------------------------
# Tiling helpers
# -----------------------------------------------------------------------------
def _round_up(x: int, m: int) -> int:
    return ((x + m - 1) // m) * m


def _vmem_config():
    """Chip-aware (tile_budget_bytes, vmem_limit_bytes)."""
    cap = 64 * 1024 * 1024  # conservative default == v7x per-TC VMEM
    try:
        info = pltpu.get_tpu_info()
        cap = int(getattr(info, "vmem_capacity_bytes", cap) or cap)
    except Exception:
        pass
    if cap <= 64 * 1024 * 1024:
        # v7x: keep the working set well under 64 MiB so double-buffering lives.
        return 36 * 1024 * 1024, 48 * 1024 * 1024
    # v5e / v6e (128 MiB VMEM): bigger tiles amortize per-grid-step overhead.
    return 60 * 1024 * 1024, 96 * 1024 * 1024


def _pick_k_tile(k_aligned: int, cap: int) -> int:
    """Largest lane-aligned (multiple-of-128) tile <= cap.

    Prefers an exact divisor of k_aligned (no padding); otherwise returns
    `cap` and the caller zero-pads K.  NEVER falls back to the full extent.
    """
    cap = max(128, (cap // 128) * 128)
    if k_aligned <= cap:
        return k_aligned
    t = cap
    while t >= 128:
        if k_aligned % t == 0:
            break
        t -= 128
    # If the best divisor is much smaller than the cap, padding is cheaper.
    return t if 2 * t >= cap else cap


# -----------------------------------------------------------------------------
# Wrapper
# -----------------------------------------------------------------------------
def featurize(x_nchw: jax.Array, w: jax.Array, *, normalize: bool = True,
              max_tb: int = 512, max_tk: int = 2048) -> jax.Array:
    """Pallas equivalent of Featurizer.forward.

    x_nchw: (B, C, H, W) images; streamed in native dtype, cast to bf16 in-kernel.
    w:      (K, D) projection weight, K = C*H*W.  Pass bf16 (cast once at init);
            it is the dominant HBM stream.
    Returns (B, D) float32, L2-normalized along the last dim if `normalize`.
    """
    B = x_nchw.shape[0]
    K = math.prod(x_nchw.shape[1:])
    assert w.shape[0] == K, (w.shape, K)
    D = w.shape[1]

    if w.dtype != jnp.bfloat16:
        # One-time fallback; in steady-state inference pre-cast w at model init.
        w = w.astype(jnp.bfloat16)

    x_flat = x_nchw.reshape(B, K)  # metadata-only row-major flatten (like torch)
    x_item = jnp.dtype(x_flat.dtype).itemsize

    tile_budget, vmem_limit = _vmem_config()

    # Batch tile: as large as B allows (weight reuse), sublane-aligned.
    tb = min(_round_up(max_tb, 8), _round_up(B, 8))

    # K tile: sized so the double-buffered working set fits the VMEM budget:
    #   2*tb*tk*x_item (x tiles) + 2*tk*D*2 (bf16 w tiles) + 2*tb*D*4 (f32 out)
    def _tk_cap(tb_):
        rem = tile_budget - 2 * tb_ * D * 4
        return rem // (2 * tb_ * x_item + 2 * D * 2)

    while tb > 8 and _tk_cap(tb) < 128:
        tb -= 8  # shrink batch tile until at least one lane-aligned K tile fits

    k_aligned = _round_up(K, 128)
    tk_cap = max(128, min(max_tk, _tk_cap(tb)))
    tk = _pick_k_tile(k_aligned, tk_cap)

    # Pad to tile multiples (zero K-padding contributes 0 to the dot product;
    # padded batch rows are sliced off below).
    B_pad = _round_up(B, tb)
    K_pad = _round_up(K, tk)
    if (B_pad, K_pad) != (B, K):
        x_flat = jnp.pad(x_flat, ((0, B_pad - B), (0, K_pad - K)))
    if K_pad != K:
        w = jnp.pad(w, ((0, K_pad - K), (0, 0)))

    nb, nk = B_pad // tb, K_pad // tk

    cost = pl.CostEstimate(
        flops=2 * B_pad * K_pad * D,
        transcendentals=B_pad,
        bytes_accessed=B_pad * K_pad * x_item + nb * K_pad * D * 2 + B_pad * D * 4,
    )

    out = pl.pallas_call(
        functools.partial(_featurizer_kernel, normalize=normalize),
        out_shape=jax.ShapeDtypeStruct((B_pad, D), jnp.float32),
        grid_spec=pltpu.PrefetchScalarGridSpec(
            num_scalar_prefetch=0,
            grid=(nb, nk),
            in_specs=[
                pl.BlockSpec((tb, tk), lambda b, k: (b, k)),
                pl.BlockSpec((tk, D), lambda b, k: (k, 0)),
            ],
            # Same output block across the K axis -> output-resident accumulator.
            out_specs=pl.BlockSpec((tb, D), lambda b, k: (b, 0)),
        ),
        compiler_params=pltpu.CompilerParams(
            # Batch axis parallel (megacore), trailing K reduction "arbitrary".
            # TODO(synk): on v7x with nb == 1, a D-split across the two TCs
            # (plus a tiny cross-TC norm fix-up) would use both cores without
            # duplicating the weight HBM stream.
            dimension_semantics=("parallel", "arbitrary"),
            vmem_limit_bytes=vmem_limit,
        ),
        cost_estimate=cost,
    )(x_flat, w)

    return out[:B] if B_pad != B else out


# -----------------------------------------------------------------------------
# References
# -----------------------------------------------------------------------------
def _reference_f32(x_nchw, w_f32):
    B = x_nchw.shape[0]
    feats = jnp.dot(x_nchw.reshape(B, -1), w_f32, preferred_element_type=jnp.float32)
    n = jnp.sqrt(jnp.sum(feats * feats, axis=-1, keepdims=True))
    return feats / jnp.maximum(n, 1e-12)


def _reference_bf16(x_nchw, w_f32):
    B = x_nchw.shape[0]
    feats = jnp.dot(x_nchw.reshape(B, -1).astype(jnp.bfloat16),
                    w_f32.astype(jnp.bfloat16),
                    preferred_element_type=jnp.float32)
    n = jnp.sqrt(jnp.sum(feats * feats, axis=-1, keepdims=True))
    return feats / jnp.maximum(n, 1e-12)


if __name__ == "__main__":
    # Small shapes consistent with an image featurizer: NCHW input.
    B, C, H, W = 2, 4, 16, 16
    D = 128            # feature dim (lane-friendly)
    K = C * H * W      # 1024

    key = jax.random.PRNGKey(0)
    kx, kw = jax.random.split(key)
    x = jax.random.normal(kx, (B, C, H, W), dtype=jnp.float32)
    # TODO(synk): model.encode_image is an arbitrary injected encoder; modeled
    # here as a single flatten + linear projection (the MXU-relevant hot path).
    w_f32 = jax.random.normal(kw, (K, D), dtype=jnp.float32) * (1.0 / (K ** 0.5))

    # Weight is a constant: cast to bf16 ONCE at "model init", not per call.
    w_bf16 = w_f32.astype(jnp.bfloat16)

    out = jax.block_until_ready(featurize(x, w_bf16))
    assert out.shape == (B, D)
    assert out.dtype == jnp.float32

    # bf16-streamed reference (loose tolerance: split-K accumulation order may
    # differ from XLA's single dot, so this is not an exact-bit comparison).
    ref_bf16 = _reference_bf16(x, w_f32)
    assert jnp.allclose(out, ref_bf16, atol=1e-2, rtol=1e-2), "mismatch vs bf16 ref"

    # Semantics sanity vs full-f32 path (only bf16 streaming error remains).
    ref_f32 = _reference_f32(x, w_f32)
    assert jnp.allclose(out, ref_f32, atol=2e-2, rtol=2e-2), "mismatch vs f32 ref"

    # Rows are unit L2 norm (F.normalize semantics; normalization done in f32).
    assert jnp.allclose(jnp.linalg.norm(out, axis=-1), 1.0, atol=1e-5)

    print("KERNEL_OK")
</pallas_src>

<mosaic_0001>
module attributes {stable_mosaic.version = 11 : i64} {
  func.func @_featurizer_kernel(%arg0: i32, %arg1: i32, %arg2: memref<8x1024xf32, #tpu.memory_space<vmem>>, %arg3: memref<1024x128xbf16, #tpu.memory_space<vmem>>, %arg4: memref<8x128xf32, #tpu.memory_space<vmem>>) attributes {dimension_semantics = [#tpu.dimension_semantics<parallel>, #tpu.dimension_semantics<arbitrary>], iteration_bounds = array<i64: 1, 1>, scalar_prefetch = 0 : i64, scratch_operands = 0 : i64, tpu.core_type = #tpu.core_type<tc>, window_params = [{transform_indices = @transform_0, window_bounds = array<i64: 8, 1024>}, {transform_indices = @transform_1, window_bounds = array<i64: 1024, 128>}, {transform_indices = @transform_2, window_bounds = array<i64: 8, 128>}]} {
    %c0_i32 = arith.constant 0 : i32
    %0 = arith.cmpi eq, %arg1, %c0_i32 : i32
    %1 = arith.extui %0 : i1 to i32
    %c0_i32_0 = arith.constant 0 : i32
    %2 = arith.cmpi ne, %1, %c0_i32_0 : i32
    scf.if %2 {
      %cst_10 = arith.constant 0.000000e+00 : f32
      %13 = vector.broadcast %cst_10 : f32 to vector<8x128xf32>
      %c0_11 = arith.constant 0 : index
      %c0_12 = arith.constant 0 : index
      %14 = vector.load %arg4[%c0_11, %c0_12] : memref<8x128xf32, #tpu.memory_space<vmem>>, vector<8x128xf32>
      tpu.vector_store %arg4[%c0_11, %c0_12], %13 {strides = array<i32>} : memref<8x128xf32, #tpu.memory_space<vmem>>, vector<8x128xf32>,
    } else {
    }
    %c0 = arith.constant 0 : index
    %c0_1 = arith.constant 0 : index
    %3 = vector.load %arg2[%c0, %c0_1] : memref<8x1024xf32, #tpu.memory_space<vmem>>, vector<8x1024xf32>
    %4 = arith.truncf %3 : vector<8x1024xf32> to vector<8x1024xbf16>
    %c0_2 = arith.constant 0 : index
    %c0_3 = arith.constant 0 : index
    %5 = vector.load %arg4[%c0_2, %c0_3] : memref<8x128xf32, #tpu.memory_space<vmem>>, vector<8x128xf32>
    %c0_4 = arith.constant 0 : index
    %c0_5 = arith.constant 0 : index
    %6 = vector.load %arg3[%c0_4, %c0_5] : memref<1024x128xbf16, #tpu.memory_space<vmem>>, vector<1024x128xbf16>
    %cst = arith.constant dense<0.000000e+00> : vector<8x128xf32>
    %7 = tpu.matmul %4, %6, %cst {dimension_numbers = #tpu.dot_dimension_numbers<[1], [0], [0], [1], [0, 0, 1, 1], [], []>} : vector<8x1024xbf16>, vector<1024x128xbf16>, vector<8x128xf32> -> vector<8x128xf32>
    %8 = arith.addf %5, %7 : vector<8x128xf32>
    %c0_6 = arith.constant 0 : index
    %c0_7 = arith.constant 0 : index
    %9 = vector.load %arg4[%c0_6, %c0_7] : memref<8x128xf32, #tpu.memory_space<vmem>>, vector<8x128xf32>
    tpu.vector_store %arg4[%c0_6, %c0_7], %8 {strides = array<i32>} : memref<8x128xf32, #tpu.memory_space<vmem>>, vector<8x128xf32>,
    %c0_i32_8 = arith.constant 0 : i32
    %10 = arith.cmpi eq, %arg1, %c0_i32_8 : i32
    %11 = arith.extui %10 : i1 to i32
    %c0_i32_9 = arith.constant 0 : i32
    %12 = arith.cmpi ne, %11, %c0_i32_9 : i32
    scf.if %12 {
      %c0_10 = arith.constant 0 : index
      %c0_11 = arith.constant 0 : index
      %13 = vector.load %arg4[%c0_10, %c0_11] : memref<8x128xf32, #tpu.memory_space<vmem>>, vector<8x128xf32>
      %14 = arith.mulf %13, %13 : vector<8x128xf32>
      %cst_12 = arith.constant dense<0.000000e+00> : vector<8xf32>
      %15 = vector.multi_reduction <add>, %14, %cst_12 [1] : vector<8x128xf32> to vector<8xf32>
      %16 = vector.shape_cast %15 : vector<8xf32> to vector<8x1xf32>
      %cst_13 = arith.constant 1.000000e-24 : f32
      %17 = vector.broadcast %cst_13 : f32 to vector<8x1xf32>
      %18 = arith.maximumf %16, %17 : vector<8x1xf32>
      %19 = math.rsqrt %18 : vector<8x1xf32>
      %20 = vector.broadcast %19 : vector<8x1xf32> to vector<8x128xf32>
      %21 = arith.mulf %13, %20 : vector<8x128xf32>
      %c0_14 = arith.constant 0 : index
      %c0_15 = arith.constant 0 : index
      %22 = vector.load %arg4[%c0_14, %c0_15] : memref<8x128xf32, #tpu.memory_space<vmem>>, vector<8x128xf32>
      tpu.vector_store %arg4[%c0_14, %c0_15], %21 {strides = array<i32>} : memref<8x128xf32, #tpu.memory_space<vmem>>, vector<8x128xf32>,
    } else {
    }
    return
  }
  func.func @transform_0(%arg0: i32, %arg1: i32) -> (i32, i32) {
    %c0_i32 = arith.constant 0 : i32
    return %arg0, %arg1 : i32, i32
  }
  func.func @transform_1(%arg0: i32, %arg1: i32) -> (i32, i32) {
    %c0_i32 = arith.constant 0 : i32
    %c0_i32_0 = arith.constant 0 : i32
    return %arg1, %c0_i32 : i32, i32
  }
  func.func @transform_2(%arg0: i32, %arg1: i32) -> (i32, i32) {
    %c0_i32 = arith.constant 0 : i32
    %c0_i32_0 = arith.constant 0 : i32
    return %arg0, %c0_i32 : i32, i32
  }
}

</mosaic_0001>

<bundles_post_ra>
// kernel: tpu_custom_call.1
= control target key start
LH: loop header
LB: loop body
LE: loop exit
PB: predicated region body
PF: predicated region fallthrough
CT: control target
= control target key end

     0   :  { %7 = vsyncpa [#allocation3], 0  ;;  %s1155_s0 = inlined_call_operand.hbm [shape: f32[8,1024], index: 0, kind: input, shape index: {}]   ;;  %s1156_s1 = inlined_call_operand.hbm [shape: bf16[1024,128], index: 1, kind: input, shape index: {}]   ;;  %s1157_s2 = inlined_call_operand.hbm [shape: f32[8,128], index: 2, kind: output, shape index: {}]  }
   0x1   :  { %8 = vsyncpa [#allocation6], 0 }
   0x2   :  { %9 = vsyncpa [#allocation4], 0  ;;  %s15_s11 = sshll.u32 %s1155_s0, 4  ;;  %s1126_s12 = smov [#allocation2]   ;;  %s16_s11 = int_to_ptr.hbm [resolvable:$true] %s15_s11 }
   0x3   :  { %s17_s13 = sshll.u32 %s1126_s12, 4  ;;  %s25_s16 = sshll.u32 %s1156_s1, 4  ;;  %s18_s13 = int_to_ptr.vmem [resolvable:$true] %s17_s13  ;;  %s26_s16 = int_to_ptr.hbm [resolvable:$true] %s25_s16 }
   0x4   :  { %20 = dma.hbm_to_vmem [thread:$0]  %s16_s11, 1024, %s18_s13, [#allocation3]  }
   0x5   :  { %s1127_s17 = smov [#allocation5]   ;;  %s1128_s19 = smov 64  }
   0x6   :  { %s27_s18 = sshll.u32 %s1127_s17, 4  ;;  %s1129_s20 = smov 4   ;;  %s28_s18 = int_to_ptr.vmem [resolvable:$true] %s27_s18 }
   0x7   :  { %33 = dma.hbm_to_vmem [thread:$0]  %s26_s16, 8192, %s28_s18, [#allocation6], %s1128_s19, %s1128_s19, %s1129_s20  }
   0x8   :  { %1120 = dma.done.wait [#allocation3], 1024  }
   0x9   :  { %1121 = vsyncadd [#allocation3], 4294966272 }
   0xa   :  { %1122 = dma.done.wait [#allocation6], 8192  }
   0xb   :  { %1123 = vsyncadd [#allocation6], 4294959104  ;;  %v983_v0 = vld [vmem:[#allocation5 + $0x38] sm:$0xff]  ;;  %v982_v4 = vld [vmem:[#allocation5 + $0x30] sm:$0xff]  ;;  %s1130_s0 = smov [#allocation7]   ;;  %s709_s23 = sshll.u32 %s1157_s2, 4  ;;  %s710_s23 = int_to_ptr.hbm [resolvable:$true] %s709_s23 }
   0xc   :  { %v991_v1 = vld [vmem:[#allocation5 + $0x78] sm:$0xff]  ;;  %576 = vmatpush.bf16.msra.mxu0 %v983_v0  ;;  %v990_v5 = vld [vmem:[#allocation5 + $0x70] sm:$0xff]  ;;  %v981_v8 = vld [vmem:[#allocation5 + $0x28] sm:$0xff]  ;;  %s707_s1 = sshll.u32 %s1130_s0, 4  ;;  %s708_s1 = int_to_ptr.vmem [resolvable:$true] %s707_s1 }
   0xd   :  { %v999_v2 = vld [vmem:[#allocation5 + $0xb8] sm:$0xff]  ;;  %589 = vmatpush.bf16.msra.mxu1 %v991_v1  ;;  %v998_v6 = vld [vmem:[#allocation5 + $0xb0] sm:$0xff]  ;;  %v989_v9 = vld [vmem:[#allocation5 + $0x68] sm:$0xff] }
   0xe   :  { %v1007_v3 = vld [vmem:[#allocation5 + $0xf8] sm:$0xff]  ;;  %602 = vmatpush.bf16.msra.mxu2 %v999_v2  ;;  %v1006_v7 = vld [vmem:[#allocation5 + $0xf0] sm:$0xff]  ;;  %v997_v10 = vld [vmem:[#allocation5 + $0xa8] sm:$0xff] }
   0xf   :  { %615 = vmatpush.bf16.msra.mxu3 %v1007_v3  ;;  %v1005_v11 = vld [vmem:[#allocation5 + $0xe8] sm:$0xff]  ;;  %v980_v12 = vld [vmem:[#allocation5 + $0x20] sm:$0xff]  ;;  %v979_v16 = vld [vmem:[#allocation5 + $0x18] sm:$0xff] }
  0x10   :  { %577 = vmatpush.bf16.msra.mxu0 %v982_v4  ;;  %v988_v13 = vld [vmem:[#allocation5 + $0x60] sm:$0xff]  ;;  %v987_v17 = vld [vmem:[#allocation5 + $0x58] sm:$0xff]  ;;  %v978_v20 = vld [vmem:[#allocation5 + $0x10] sm:$0xff] }
  0x11   :  { %590 = vmatpush.bf16.msra.mxu1 %v990_v5  ;;  %v996_v14 = vld [vmem:[#allocation5 + $0xa0] sm:$0xff]  ;;  %v995_v18 = vld [vmem:[#allocation5 + $0x98] sm:$0xff]  ;;  %v986_v21 = vld [vmem:[#allocation5 + $0x50] sm:$0xff] }
  0x12   :  { %603 = vmatpush.bf16.msra.mxu2 %v998_v6  ;;  %v1004_v15 = vld [vmem:[#allocation5 + $0xe0] sm:$0xff]  ;;  %v1003_v19 = vld [vmem:[#allocation5 + $0xd8] sm:$0xff]  ;;  %v994_v22 = vld [vmem:[#allocation5 + $0x90] sm:$0xff] }
  0x13   :  { %616 = vmatpush.bf16.msra.mxu3 %v1006_v7  ;;  %v1002_v23 = vld [vmem:[#allocation5 + $0xd0] sm:$0xff]  ;;  %v977_v24 = vld [vmem:[#allocation5 + $0x8] sm:$0xff]  ;;  %v976_v28 = vld [vmem:[#allocation5] sm:$0xff] }
  0x14   :  { %578 = vmatpush.bf16.msra.mxu0 %v981_v8  ;;  %v985_v25 = vld [vmem:[#allocation5 + $0x48] sm:$0xff]  ;;  %v984_v29 = vld [vmem:[#allocation5 + $0x40] sm:$0xff]  ;;  %v1015_v32 = vld [vmem:[#allocation5 + $0x138] sm:$0xff] }
  0x15   :  { %591 = vmatpush.bf16.msra.mxu1 %v989_v9  ;;  %v993_v26 = vld [vmem:[#allocation5 + $0x88] sm:$0xff]  ;;  %v992_v30 = vld [vmem:[#allocation5 + $0x80] sm:$0xff]  ;;  %v49_v33 = vld [vmem:[#allocation2 + $0x10] sm:$0xff] }
  0x16   :  { %604 = vmatpush.bf16.msra.mxu2 %v997_v10  ;;  %v1001_v27 = vld [vmem:[#allocation5 + $0xc8] sm:$0xff]  ;;  %v1000_v31 = vld [vmem:[#allocation5 + $0xc0] sm:$0xff]  ;;  %v1023_v35 = vld [vmem:[#allocation5 + $0x178] sm:$0xff]  ;;  %v57_v40 = vpack.c.bf16 %v49_v33, %v49_v33 }
  0x17   :  { %617 = vmatpush.bf16.msra.mxu3 %v1005_v11  ;;  %v47_v34 = vld [vmem:[#allocation2] sm:$0xff]  ;;  %v50_v36 = vld [vmem:[#allocation2 + $0x18] sm:$0xff]  ;;  %v48_v37 = vld [vmem:[#allocation2 + $0x8] sm:$0xff] }
  0x18   :  { %579 = vmatpush.bf16.msra.mxu0 %v980_v12  ;;  %v1031_v38 = vld [vmem:[#allocation5 + $0x1b8] sm:$0xff]  ;;  %v55_v41 = vpack.c.bf16 %v47_v34, %v47_v34  ;;  %v58_v42 = vpack.c.bf16 %v50_v36, %v50_v36  ;;  %v56_v43 = vpack.c.bf16 %v48_v37, %v48_v37  ;;  %v1014_v44 = vld [vmem:[#allocation5 + $0x130] sm:$0xff]  ;;  %v1013_v48 = vld [vmem:[#allocation5 + $0x128] sm:$0xff] }
  0x19   :  { %592 = vmatpush.bf16.msra.mxu1 %v988_v13  ;;  %v1039_v39 = vld [vmem:[#allocation5 + $0x1f8] sm:$0xff]  ;;  %v1022_v45 = vld [vmem:[#allocation5 + $0x170] sm:$0xff]  ;;  %v1021_v49 = vld [vmem:[#allocation5 + $0x168] sm:$0xff] }
  0x1a   :  { %605 = vmatpush.bf16.msra.mxu2 %v996_v14  ;;  %v1030_v46 = vld [vmem:[#allocation5 + $0x1b0] sm:$0xff]  ;;  %v1029_v50 = vld [vmem:[#allocation5 + $0x1a8] sm:$0xff]  ;;  %v1012_v52 = vld [vmem:[#allocation5 + $0x120] sm:$0xff] }
  0x1b   :  { %618 = vmatpush.bf16.msra.mxu3 %v1004_v15  ;;  %v1038_v47 = vld [vmem:[#allocation5 + $0x1f0] sm:$0xff]  ;;  %v1037_v51 = vld [vmem:[#allocation5 + $0x1e8] sm:$0xff]  ;;  %v1020_v53 = vld [vmem:[#allocation5 + $0x160] sm:$0xff] }
  0x1c   :  { %580 = vmatpush.bf16.msra.mxu0 %v979_v16  ;;  %v1028_v54 = vld [vmem:[#allocation5 + $0x1a0] sm:$0xff]  ;;  %v1011_v56 = vld [vmem:[#allocation5 + $0x118] sm:$0xff]  ;;  %v1010_v60 = vld [vmem:[#allocation5 + $0x110] sm:$0xff] }
  0x1d   :  { %593 = vmatpush.bf16.msra.mxu1 %v987_v17  ;;  %v1036_v55 = vld [vmem:[#allocation5 + $0x1e0] sm:$0xff]  ;;  %v1019_v57 = vld [vmem:[#allocation5 + $0x158] sm:$0xff]  ;;  %v1018_v61 = vld [vmem:[#allocation5 + $0x150] sm:$0xff] }
  0x1e   :  { %606 = vmatpush.bf16.msra.mxu2 %v995_v18  ;;  %v1027_v58 = vld [vmem:[#allocation5 + $0x198] sm:$0xff]  ;;  %v1026_v62 = vld [vmem:[#allocation5 + $0x190] sm:$0xff]  ;;  %v1009_v0 = vld [vmem:[#allocation5 + $0x108] sm:$0xff] }
  0x1f   :  { %619 = vmatpush.bf16.msra.mxu3 %v1003_v19  ;;  %v1035_v59 = vld [vmem:[#allocation5 + $0x1d8] sm:$0xff]  ;;  %v1034_v63 = vld [vmem:[#allocation5 + $0x1d0] sm:$0xff]  ;;  %v1017_v1 = vld [vmem:[#allocation5 + $0x148] sm:$0xff] }
  0x20   :  { %581 = vmatpush.bf16.msra.mxu0 %v978_v20  ;;  %v1025_v2 = vld [vmem:[#allocation5 + $0x188] sm:$0xff]  ;;  %v1008_v4 = vld [vmem:[#allocation5 + $0x100] sm:$0xff]  ;;  %v53_v10 = vld [vmem:[#allocation2 + $0x30] sm:$0xff] }
  0x21   :  { %594 = vmatpush.bf16.msra.mxu1 %v986_v21  ;;  %v1033_v3 = vld [vmem:[#allocation5 + $0x1c8] sm:$0xff]  ;;  %v1016_v5 = vld [vmem:[#allocation5 + $0x140] sm:$0xff]  ;;  %v54_v11 = vld [vmem:[#allocation2 + $0x38] sm:$0xff]  ;;  %v61_v14 = vpack.c.bf16 %v53_v10, %v53_v10 }
  0x22   :  { %607 = vmatpush.bf16.msra.mxu2 %v994_v22  ;;  %v1024_v6 = vld [vmem:[#allocation5 + $0x180] sm:$0xff]  ;;  %v52_v8 = vld [vmem:[#allocation2 + $0x28] sm:$0xff]  ;;  %v62_v15 = vpack.c.bf16 %v54_v11, %v54_v11 }
  0x23   :  { %620 = vmatpush.bf16.msra.mxu3 %v1002_v23  ;;  %v51_v7 = vld [vmem:[#allocation2 + $0x20] sm:$0xff]  ;;  %v60_v13 = vpack.c.bf16 %v52_v8, %v52_v8 }
  0x24   :  { %582 = vmatpush.bf16.msra.mxu0 %v977_v24  ;;  %v1032_v9 = vld [vmem:[#allocation5 + $0x1c0] sm:$0xff]  ;;  %v59_v12 = vpack.c.bf16 %v51_v7, %v51_v7 }
  0x25   :  { %595 = vmatpush.bf16.msra.mxu1 %v985_v25 }
  0x26   :  { %608 = vmatpush.bf16.msra.mxu2 %v993_v26 }
  0x27   :  { %621 = vmatpush.bf16.msra.mxu3 %v1001_v27 }
  0x28   :  { %583 = vmatpush.bf16.msra.mxu0 %v976_v28 }
  0x29   :  { %596 = vmatpush.bf16.msra.mxu1 %v984_v29 }
  0x2a   :  { %609 = vmatpush.bf16.msra.mxu2 %v992_v30 }
  0x2b   :  { %622 = vmatpush.bf16.msra.mxu3 %v1000_v31  ;;  %584 = vmatmul.bf16.vlgmr.msra.gmra.mxu0 %v55_v41 }
  0x2c   :  { %628 = vmatpush.bf16.msrb.mxu0 %v1015_v32  ;;  %597 = vmatmul.bf16.vlgmr.msra.gmra.mxu1 %v56_v43 }
  0x2d   :  { %641 = vmatpush.bf16.msrb.mxu1 %v1023_v35  ;;  %610 = vmatmul.bf16.vlgmr.msra.gmra.mxu2 %v57_v40 }
  0x2e   :  { %654 = vmatpush.bf16.msrb.mxu2 %v1031_v38  ;;  %623 = vmatmul.bf16.vlgmr.msra.gmra.mxu3 %v58_v42 }
  0x2f   :  { %667 = vmatpush.bf16.msrb.mxu3 %v1039_v39 }
  0x30   :  { %629 = vmatpush.bf16.msrb.mxu0 %v1014_v44 }
  0x31   :  { %642 = vmatpush.bf16.msrb.mxu1 %v1022_v45 }
  0x32   :  { %655 = vmatpush.bf16.msrb.mxu2 %v1030_v46 }
  0x33   :  { %668 = vmatpush.bf16.msrb.mxu3 %v1038_v47 }
  0x34   :  { %630 = vmatpush.bf16.msrb.mxu0 %v1013_v48 }
  0x35   :  { %643 = vmatpush.bf16.msrb.mxu1 %v1021_v49 }
  0x36   :  { %656 = vmatpush.bf16.msrb.mxu2 %v1029_v50 }
  0x37   :  { %669 = vmatpush.bf16.msrb.mxu3 %v1037_v51 }
  0x38   :  { %631 = vmatpush.bf16.msrb.mxu0 %v1012_v52 }
  0x39   :  { %644 = vmatpush.bf16.msrb.mxu1 %v1020_v53 }
  0x3a   :  { %657 = vmatpush.bf16.msrb.mxu2 %v1028_v54 }
  0x3b   :  { %670 = vmatpush.bf16.msrb.mxu3 %v1036_v55 }
  0x3c   :  { %632 = vmatpush.bf16.msrb.mxu0 %v1011_v56 }
  0x3d   :  { %645 = vmatpush.bf16.msrb.mxu1 %v1019_v57 }
  0x3e   :  { %658 = vmatpush.bf16.msrb.mxu2 %v1027_v58 }
  0x3f   :  { %671 = vmatpush.bf16.msrb.mxu3 %v1035_v59 }
  0x40   :  { %633 = vmatpush.bf16.msrb.mxu0 %v1010_v60 }
  0x41   :  { %646 = vmatpush.bf16.msrb.mxu1 %v1018_v61 }
  0x42   :  { %659 = vmatpush.bf16.msrb.mxu2 %v1026_v62 }
  0x43   :  { %672 = vmatpush.bf16.msrb.mxu3 %v1034_v63 }
  0x44   :  { %634 = vmatpush.bf16.msrb.mxu0 %v1009_v0 }
  0x45   :  { %647 = vmatpush.bf16.msrb.mxu1 %v1017_v1 }
  0x46   :  { %660 = vmatpush.bf16.msrb.mxu2 %v1025_v2 }
  0x47   :  { %673 = vmatpush.bf16.msrb.mxu3 %v1033_v3 }
  0x48   :  { %635 = vmatpush.bf16.msrb.mxu0 %v1008_v4 }
  0x49   :  { %648 = vmatpush.bf16.msrb.mxu1 %v1016_v5 }
  0x4a   :  { %661 = vmatpush.bf16.msrb.mxu2 %v1024_v6 }
  0x4b   :  { %674 = vmatpush.bf16.msrb.mxu3 %v1032_v9  ;;  %636 = vmatmul.bf16.vlgmr.msrb.gmra.mxu0 %v59_v12 }
  0x4c   :  { %649 = vmatmul.bf16.vlgmr.msrb.gmra.mxu1 %v60_v13 }
  0x4d   :  { %662 = vmatmul.bf16.vlgmr.msrb.gmra.mxu2 %v61_v14 }
  0x4e   :  { %675 = vmatmul.bf16.vlgmr.msrb.gmra.mxu3 %v62_v15 }
  0xa8   :  { %v585_v16 = vpop.f32.mrf.mxu0 }
  0xa9   :  { %v598_v17 = vpop.f32.mrf.mxu1 }
  0xaa   :  { %v599_v24 = vadd.f32 %v598_v17, %v585_v16 }
  0xb0   :  { %v611_v18 = vpop.f32.mrf.mxu2  ;;  %v587_v20 = vpop.f32.mrf.mxu0 }
  0xb1   :  { %v624_v19 = vpop.f32.mrf.mxu3  ;;  %v600_v21 = vpop.f32.mrf.mxu1  ;;  %v612_v25 = vadd.f32 %v611_v18, %v599_v24 }
  0xb3   :  { %v625_v26 = vadd.f32 %v624_v19, %v612_v25 }
  0xb8   :  { %v613_v22 = vpop.f32.mrf.mxu2 }
  0xb9   :  { %v626_v23 = vpop.f32.mrf.mxu3 }
  0xc8   :  { %v637_v27 = vpop.f32.mrf.mxu0 }
  0xc9   :  { %v650_v28 = vpop.f32.mrf.mxu1  ;;  %v638_v29 = vadd.f32 %v637_v27, %v625_v26 }
  0xcb   :  { %v651_v30 = vadd.f32 %v650_v28, %v638_v29 }
  0xd0   :  { %v663_v31 = vpop.f32.mrf.mxu2  ;;  %v639_v34 = vpop.f32.mrf.mxu0 }
  0xd1   :  { %v676_v32 = vpop.f32.mrf.mxu3  ;;  %v664_v33 = vadd.f32 %v663_v31, %v651_v30  ;;  %v652_v35 = vpop.f32.mrf.mxu1 }
  0xd3   :  { %v677_v36 = vadd.f32 %v676_v32, %v664_v33 }
  0xd5   :  { %v686_v37 = vmul.f32 %v677_v36, %v677_v36 }
  0xd7   :  { %687 = vadd.xlane.f32.xlu0 %v686_v37 }
  0xd8   :  { %v665_v38 = vpop.f32.mrf.mxu2 }
  0xd9   :  { %v678_v39 = vpop.f32.mrf.mxu3 }
 0x14a   :  { %v688_v40 = vpop.xlane.xlu0 %687 }
 0x14b   :  { %v689_v41 = vmax.f32 %v688_v40, 1e-24 }
 0x14d   :  { %1046 = vrsqrt.f32 %v689_v41  ;;  %vm696_vm1 = vweird.f32 %v689_v41 }
 0x153   :  { %v1047_v42 = vpop.eup %1046 }
 0x154   :  { %v691_v43 = vmul.f32 %v1047_v42, %v689_v41  ;;  %vm697_vm0 = vweird.f32 %v1047_v42 }
 0x155   :  { %vm698_vm2 = vmor %vm696_vm1, %vm697_vm0 }
 0x156   :  { %v692_v44 = vmul.f32 %v1047_v42, %v691_v43 }
 0x158   :  { %v693_v45 = vmul.f32 0.5, %v692_v44 }
 0x15a   :  { %v694_v46 = vsub.f32 1.5, %v693_v45 }
 0x15c   :  { %v695_v47 = vmul.f32 %v1047_v42, %v694_v46 }
 0x15e   :  { %v699_v48 = vsel %vm698_vm2, %v1047_v42, %v695_v47 }
 0x15f   :  { %v700_v49 = vmul.f32 %v699_v48, %v677_v36 }
 0x161   :  { %701 = vst [vmem:[#allocation7] sm:$0xff] %v700_v49 }
 0x162   :  { %712 = dma.vmem_to_hbm [thread:$0]  %s708_s1, 128, %s710_s23, [#allocation4]  }
 0x163   :  { %1124 = dma.done.wait [#allocation4], 128  }
 0x164   :  { %1125 = vsyncadd [#allocation4], 4294967168 }
 0x165   :  { %717 = vsyncpa [#allocation3], 1 }
 0x166   :  { %718 = vsyncpa [#allocation6], 1 }
 0x167   :  { %719 = vsyncpa [#allocation4], 1 }

</bundles_post_ra>
